<compile_context>
chip_gen: v7x
topology: tpu7x:2x2x1
jax: 0.10.0
libtpu: 0.0.40
codegen_flags: <defaults>
</compile_context>

<pallas_src>
import jax
import jax.numpy as jnp
from jax.experimental import pallas as pl
from jax.experimental.pallas import tpu as pltpu

HIDDEN1 = 512
HIDDEN2 = 64
TB_MAX = 4096          # batch-tile rows; h1 f32 intermediate = TB*512*4 B = 8 MiB
LANE = 128             # TPU lane width
NEG_BIG = -1e30        # logit bias for padded action lanes -> exp() == 0


def _round_up(n, m):
    return ((n + m - 1) // m) * m


def social_mask_kernel(x_ref, w1_ref, b1_ref, w2_ref, b2_ref, w3_ref, b3_ref,
                       o_ref):
    # x arrives f32; cast to bf16 in-kernel (VPU convert hides under MXU slack).
    x = x_ref[...].astype(jnp.bfloat16)

    # affine1 + ReLU   (bf16 MXU, f32 accumulate; epilogue stays f32)
    h1 = jnp.dot(x, w1_ref[...], preferred_element_type=jnp.float32)
    h1 = jnp.maximum(h1 + b1_ref[...], 0.0)

    # affine2 + ReLU
    h2 = jnp.dot(h1.astype(jnp.bfloat16), w2_ref[...],
                 preferred_element_type=jnp.float32)
    h2 = jnp.maximum(h2 + b2_ref[...], 0.0)

    # affine3 (lane-padded to 128 columns; padded columns get NEG_BIG bias)
    logits = jnp.dot(h2.astype(jnp.bfloat16), w3_ref[...],
                     preferred_element_type=jnp.float32)
    logits = logits + b3_ref[...]

    # Numerically stable softmax over dim=1. Padded lanes contribute exactly 0.
    m = jnp.max(logits, axis=1, keepdims=True)
    e = jnp.exp(logits - m)
    denom = jnp.sum(e, axis=1, keepdims=True)
    inv = pl.reciprocal(denom, approx=True)       # EUP slot
    inv = inv * (2.0 - denom * inv)               # one Newton step -> ~f32-exact
    o_ref[...] = (e * inv).astype(o_ref.dtype)


def _vmem_budget_bytes(tb, state_dim, act_pad):
    # Resident bf16 weights + f32 biases.
    w_bytes = (state_dim * HIDDEN1 + HIDDEN1 * HIDDEN2 + HIDDEN2 * act_pad) * 2
    b_bytes = (HIDDEN1 + HIDDEN2 + act_pad) * 4
    # Double-buffered streaming tiles (x is f32 in, output is f32 lane-padded).
    x_bytes = 2 * tb * state_dim * 4
    o_bytes = 2 * tb * act_pad * 4
    # f32 intermediates (h1, h2, logits, e).
    interm = tb * (HIDDEN1 + HIDDEN2 + 2 * act_pad) * 4
    total = w_bytes + b_bytes + x_bytes + o_bytes + interm
    # ~1.4x slack for compiler temporaries; cap at 40 MiB (v7x has 64 MiB).
    return int(min(max(int(1.4 * total), 8 << 20), 40 << 20))


def social_mask_forward(x, params):
    """x: (B, state_dim) float32. params: bf16 weights (in,out), f32 biases."""
    w1, b1, w2, b2, w3, b3 = (params["w1"], params["b1"], params["w2"],
                              params["b2"], params["w3"], params["b3"])
    B, state_dim = x.shape
    action_dim = w3.shape[1]

    # Lane-dense output: pad the last layer to a multiple of 128 lanes.
    act_pad = max(LANE, _round_up(action_dim, LANE))
    pad = act_pad - action_dim
    w3p = jnp.pad(w3, ((0, 0), (0, pad)))                              # zeros
    b3p = jnp.pad(b3, ((0, 0), (0, pad)), constant_values=NEG_BIG)     # -> exp()=0

    # Batch tile: aim for >= 2 grid steps (v7x dual-core), cap at TB_MAX so
    # intermediates fit comfortably in VMEM; multiple of 8 sublanes.
    tb = max(8, min(TB_MAX, _round_up(pl.cdiv(B, 2), 8)))
    grid = (pl.cdiv(B, tb),)

    out_padded = pl.pallas_call(
        social_mask_kernel,
        out_shape=jax.ShapeDtypeStruct((B, act_pad), jnp.float32),
        grid=grid,
        in_specs=[
            # Streamed batch tile of activations (f32; cast in-kernel).
            pl.BlockSpec((tb, state_dim), lambda i: (i, 0)),
            # Weights / biases: same block every step -> stay resident in VMEM.
            pl.BlockSpec(w1.shape, lambda i: (0, 0)),
            pl.BlockSpec(b1.shape, lambda i: (0, 0)),
            pl.BlockSpec(w2.shape, lambda i: (0, 0)),
            pl.BlockSpec(b2.shape, lambda i: (0, 0)),
            pl.BlockSpec(w3p.shape, lambda i: (0, 0)),
            pl.BlockSpec(b3p.shape, lambda i: (0, 0)),
        ],
        out_specs=pl.BlockSpec((tb, act_pad), lambda i: (i, 0)),
        compiler_params=pltpu.CompilerParams(
            dimension_semantics=("parallel",),
            vmem_limit_bytes=_vmem_budget_bytes(tb, state_dim, act_pad),
        ),
    )(x, w1, b1, w2, b2, w3p, b3p)

    # Drop the padded action lanes (their softmax mass is exactly 0).
    return out_padded[:, :action_dim]


def init_params(key, state_dim, action_dim):
    """Deterministic synthetic parameters (PyTorch nn.Linear-style init,
    stored transposed as (in, out); weights pre-cast to bf16, biases f32)."""
    k1, k2, k3, k4, k5, k6 = jax.random.split(key, 6)

    def u(k, shape, fan_in):
        bound = 1.0 / jnp.sqrt(fan_in)
        return jax.random.uniform(k, shape, jnp.float32, -bound, bound)

    return {
        "w1": u(k1, (state_dim, HIDDEN1), state_dim).astype(jnp.bfloat16),
        "b1": u(k2, (1, HIDDEN1), state_dim),
        "w2": u(k3, (HIDDEN1, HIDDEN2), HIDDEN1).astype(jnp.bfloat16),
        "b2": u(k4, (1, HIDDEN2), HIDDEN1),
        "w3": u(k5, (HIDDEN2, action_dim), HIDDEN2).astype(jnp.bfloat16),
        "b3": u(k6, (1, action_dim), HIDDEN2),
    }


def reference_forward(x, p):
    """Pure-JAX reference with the same bf16-in / f32-accumulate matmuls."""
    def mm(a, w):
        return jnp.dot(a.astype(jnp.bfloat16), w,
                       preferred_element_type=jnp.float32)
    h1 = jnp.maximum(mm(x, p["w1"]) + p["b1"], 0.0)
    h2 = jnp.maximum(mm(h1, p["w2"]) + p["b2"], 0.0)
    logits = mm(h2, p["w3"]) + p["b3"]
    return jax.nn.softmax(logits, axis=1)


if __name__ == "__main__":
    key = jax.random.PRNGKey(0)
    k_x, k_p = jax.random.split(key)

    batch = 64
    state_dim = 32
    action_dim = 8

    x = jax.random.normal(k_x, (batch, state_dim), jnp.float32)
    params = init_params(k_p, state_dim, action_dim)

    out = social_mask_forward(x, params)
    out = jax.block_until_ready(out)

    ref = reference_forward(x, params)
    assert out.shape == (batch, action_dim)
    # Kernel vs bf16-matched reference.
    assert jnp.allclose(out, ref, atol=2e-3, rtol=2e-3)
    # Rows of a softmax sum to 1 (Newton-refined reciprocal -> f32-exact).
    assert jnp.allclose(jnp.sum(out, axis=1), jnp.ones((batch,)), atol=2e-3)

    print("KERNEL_OK")
</pallas_src>

<mosaic_0001>
module attributes {stable_mosaic.version = 11 : i64} {
  func.func @social_mask_kernel(%arg0: i32, %arg1: memref<32x32xf32, #tpu.memory_space<vmem>>, %arg2: memref<32x512xbf16, #tpu.memory_space<vmem>>, %arg3: memref<1x512xf32, #tpu.memory_space<vmem>>, %arg4: memref<512x64xbf16, #tpu.memory_space<vmem>>, %arg5: memref<1x64xf32, #tpu.memory_space<vmem>>, %arg6: memref<64x128xbf16, #tpu.memory_space<vmem>>, %arg7: memref<1x128xf32, #tpu.memory_space<vmem>>, %arg8: memref<32x128xf32, #tpu.memory_space<vmem>>) attributes {dimension_semantics = [#tpu.dimension_semantics<parallel>], iteration_bounds = array<i64: 2>, scalar_prefetch = 0 : i64, scratch_operands = 0 : i64, tpu.core_type = #tpu.core_type<tc>, window_params = [{transform_indices = @transform_0, window_bounds = array<i64: 32, 32>}, {pipeline_mode = #tpu.pipeline_mode<synchronous>, transform_indices = @transform_1, window_bounds = array<i64: 32, 512>}, {pipeline_mode = #tpu.pipeline_mode<synchronous>, transform_indices = @transform_2, window_bounds = array<i64: 1, 512>}, {pipeline_mode = #tpu.pipeline_mode<synchronous>, transform_indices = @transform_3, window_bounds = array<i64: 512, 64>}, {pipeline_mode = #tpu.pipeline_mode<synchronous>, transform_indices = @transform_4, window_bounds = array<i64: 1, 64>}, {pipeline_mode = #tpu.pipeline_mode<synchronous>, transform_indices = @transform_5, window_bounds = array<i64: 64, 128>}, {pipeline_mode = #tpu.pipeline_mode<synchronous>, transform_indices = @transform_6, window_bounds = array<i64: 1, 128>}, {transform_indices = @transform_7, window_bounds = array<i64: 32, 128>}]} {
    %c0 = arith.constant 0 : index
    %c0_0 = arith.constant 0 : index
    %0 = vector.load %arg1[%c0, %c0_0] : memref<32x32xf32, #tpu.memory_space<vmem>>, vector<32x32xf32>
    %1 = arith.truncf %0 : vector<32x32xf32> to vector<32x32xbf16>
    %c0_1 = arith.constant 0 : index
    %c0_2 = arith.constant 0 : index
    %2 = vector.load %arg2[%c0_1, %c0_2] : memref<32x512xbf16, #tpu.memory_space<vmem>>, vector<32x512xbf16>
    %cst = arith.constant dense<0.000000e+00> : vector<32x512xf32>
    %3 = tpu.matmul %1, %2, %cst {dimension_numbers = #tpu.dot_dimension_numbers<[1], [0], [0], [1], [0, 0, 1, 1], [], []>} : vector<32x32xbf16>, vector<32x512xbf16>, vector<32x512xf32> -> vector<32x512xf32>
    %c0_3 = arith.constant 0 : index
    %c0_4 = arith.constant 0 : index
    %4 = vector.load %arg3[%c0_3, %c0_4] : memref<1x512xf32, #tpu.memory_space<vmem>>, vector<1x512xf32>
    %5 = vector.broadcast %4 : vector<1x512xf32> to vector<32x512xf32>
    %6 = arith.addf %3, %5 : vector<32x512xf32>
    %cst_5 = arith.constant 0.000000e+00 : f32
    %7 = vector.broadcast %cst_5 : f32 to vector<32x512xf32>
    %8 = arith.maximumf %6, %7 : vector<32x512xf32>
    %9 = arith.truncf %8 : vector<32x512xf32> to vector<32x512xbf16>
    %c0_6 = arith.constant 0 : index
    %c0_7 = arith.constant 0 : index
    %10 = vector.load %arg4[%c0_6, %c0_7] : memref<512x64xbf16, #tpu.memory_space<vmem>>, vector<512x64xbf16>
    %cst_8 = arith.constant dense<0.000000e+00> : vector<32x64xf32>
    %11 = tpu.matmul %9, %10, %cst_8 {dimension_numbers = #tpu.dot_dimension_numbers<[1], [0], [0], [1], [0, 0, 1, 1], [], []>} : vector<32x512xbf16>, vector<512x64xbf16>, vector<32x64xf32> -> vector<32x64xf32>
    %c0_9 = arith.constant 0 : index
    %c0_10 = arith.constant 0 : index
    %12 = vector.load %arg5[%c0_9, %c0_10] : memref<1x64xf32, #tpu.memory_space<vmem>>, vector<1x64xf32>
    %13 = vector.broadcast %12 : vector<1x64xf32> to vector<32x64xf32>
    %14 = arith.addf %11, %13 : vector<32x64xf32>
    %cst_11 = arith.constant 0.000000e+00 : f32
    %15 = vector.broadcast %cst_11 : f32 to vector<32x64xf32>
    %16 = arith.maximumf %14, %15 : vector<32x64xf32>
    %17 = arith.truncf %16 : vector<32x64xf32> to vector<32x64xbf16>
    %c0_12 = arith.constant 0 : index
    %c0_13 = arith.constant 0 : index
    %18 = vector.load %arg6[%c0_12, %c0_13] : memref<64x128xbf16, #tpu.memory_space<vmem>>, vector<64x128xbf16>
    %cst_14 = arith.constant dense<0.000000e+00> : vector<32x128xf32>
    %19 = tpu.matmul %17, %18, %cst_14 {dimension_numbers = #tpu.dot_dimension_numbers<[1], [0], [0], [1], [0, 0, 1, 1], [], []>} : vector<32x64xbf16>, vector<64x128xbf16>, vector<32x128xf32> -> vector<32x128xf32>
    %c0_15 = arith.constant 0 : index
    %c0_16 = arith.constant 0 : index
    %20 = vector.load %arg7[%c0_15, %c0_16] : memref<1x128xf32, #tpu.memory_space<vmem>>, vector<1x128xf32>
    %21 = vector.broadcast %20 : vector<1x128xf32> to vector<32x128xf32>
    %22 = arith.addf %19, %21 : vector<32x128xf32>
    %cst_17 = arith.constant dense<0xFF800000> : vector<32xf32>
    %23 = vector.multi_reduction <maximumf>, %22, %cst_17 [1] : vector<32x128xf32> to vector<32xf32>
    %24 = vector.shape_cast %23 : vector<32xf32> to vector<32x1xf32>
    %25 = vector.broadcast %24 : vector<32x1xf32> to vector<32x128xf32>
    %26 = arith.subf %22, %25 : vector<32x128xf32>
    %27 = math.exp %26 : vector<32x128xf32>
    %cst_18 = arith.constant dense<0.000000e+00> : vector<32xf32>
    %28 = vector.multi_reduction <add>, %27, %cst_18 [1] : vector<32x128xf32> to vector<32xf32>
    %29 = vector.shape_cast %28 : vector<32xf32> to vector<32x1xf32>
    %30 = tpu.reciprocal %29 {approx = true} : vector<32x1xf32> -> vector<32x1xf32>
    %31 = arith.mulf %29, %30 : vector<32x1xf32>
    %cst_19 = arith.constant 2.000000e+00 : f32
    %32 = vector.broadcast %cst_19 : f32 to vector<32x1xf32>
    %33 = arith.subf %32, %31 : vector<32x1xf32>
    %34 = arith.mulf %30, %33 : vector<32x1xf32>
    %35 = vector.broadcast %34 : vector<32x1xf32> to vector<32x128xf32>
    %36 = arith.mulf %27, %35 : vector<32x128xf32>
    %c0_20 = arith.constant 0 : index
    %c0_21 = arith.constant 0 : index
    %37 = vector.load %arg8[%c0_20, %c0_21] : memref<32x128xf32, #tpu.memory_space<vmem>>, vector<32x128xf32>
    tpu.vector_store %arg8[%c0_20, %c0_21], %36 {strides = array<i32>} : memref<32x128xf32, #tpu.memory_space<vmem>>, vector<32x128xf32>,
    return
  }
  func.func @transform_0(%arg0: i32) -> (i32, i32) {
    %c0_i32 = arith.constant 0 : i32
    %c0_i32_0 = arith.constant 0 : i32
    return %arg0, %c0_i32 : i32, i32
  }
  func.func @transform_1(%arg0: i32) -> (i32, i32) {
    %c0_i32 = arith.constant 0 : i32
    %c0_i32_0 = arith.constant 0 : i32
    %c0_i32_1 = arith.constant 0 : i32
    return %c0_i32, %c0_i32_0 : i32, i32
  }
  func.func @transform_2(%arg0: i32) -> (i32, i32) {
    %c0_i32 = arith.constant 0 : i32
    %c0_i32_0 = arith.constant 0 : i32
    %c0_i32_1 = arith.constant 0 : i32
    return %c0_i32, %c0_i32_0 : i32, i32
  }
  func.func @transform_3(%arg0: i32) -> (i32, i32) {
    %c0_i32 = arith.constant 0 : i32
    %c0_i32_0 = arith.constant 0 : i32
    %c0_i32_1 = arith.constant 0 : i32
    return %c0_i32, %c0_i32_0 : i32, i32
  }
  func.func @transform_4(%arg0: i32) -> (i32, i32) {
    %c0_i32 = arith.constant 0 : i32
    %c0_i32_0 = arith.constant 0 : i32
    %c0_i32_1 = arith.constant 0 : i32
    return %c0_i32, %c0_i32_0 : i32, i32
  }
  func.func @transform_5(%arg0: i32) -> (i32, i32) {
    %c0_i32 = arith.constant 0 : i32
    %c0_i32_0 = arith.constant 0 : i32
    %c0_i32_1 = arith.constant 0 : i32
    return %c0_i32, %c0_i32_0 : i32, i32
  }
  func.func @transform_6(%arg0: i32) -> (i32, i32) {
    %c0_i32 = arith.constant 0 : i32
    %c0_i32_0 = arith.constant 0 : i32
    %c0_i32_1 = arith.constant 0 : i32
    return %c0_i32, %c0_i32_0 : i32, i32
  }
  func.func @transform_7(%arg0: i32) -> (i32, i32) {
    %c0_i32 = arith.constant 0 : i32
    %c0_i32_0 = arith.constant 0 : i32
    return %arg0, %c0_i32 : i32, i32
  }
}

</mosaic_0001>

<bundles_post_ra>
// kernel: tpu_custom_call.1
= control target key start
LH: loop header
LB: loop body
LE: loop exit
PB: predicated region body
PF: predicated region fallthrough
CT: control target
= control target key end

     0   :  { %12 = vsyncpa [#allocation3], 0  ;;  %s1688_s0 = inlined_call_operand.vmem [shape: f32[64,32], index: 0, kind: input, shape index: {}]   ;;  %s1689_s1 = inlined_call_operand.vmem [shape: bf16[32,512], index: 1, kind: input, shape index: {}]   ;;  %s1690_s2 = inlined_call_operand.vmem [shape: f32[1,512], index: 2, kind: input, shape index: {}]   ;;  %s1691_s3 = inlined_call_operand.vmem [shape: bf16[512,64], index: 3, kind: input, shape index: {}]   ;;  %s1692_s4 = inlined_call_operand.vmem [shape: f32[1,64], index: 4, kind: input, shape index: {}]   ;;  %s1693_s5 = inlined_call_operand.vmem [shape: bf16[64,128], index: 5, kind: input, shape index: {}]   ;;  %s1694_s6 = inlined_call_operand.vmem [shape: f32[1,128], index: 6, kind: input, shape index: {}]   ;;  %s1695_s7 = inlined_call_operand.hbm [shape: f32[64,128], index: 7, kind: output, shape index: {}]  }
   0x1   :  { %14 = vsyncpa [#allocation3 + $0x1], 0  ;;  %s1437_s24 = smov 0   ;;  %s1439_s25 = smov 0  }
   0x2   :  { %s1441_s26 = smov 0   ;;  %s1443_s27 = smov 0  }
   0x3 LB: > { %s1458_s28 = sadd.s32 4294967295, %s1391_s27   ;;  %s1084_s29 = sadd.s32 4294967294, %s1391_s27   ;;  %s1391_s27 = sphi %s1443_s27, %s1701_s27   ;;  %s1387_s26 = sphi %s1441_s26, %s1700_s26   ;;  %s1383_s25 = sphi %s1439_s25, %s1699_s25   ;;  %s1379_s24 = sphi %s1437_s24, %s1698_s24  }
   0x4   : > { %s1462_s30 = sadd.s32 1, %s1391_s27   ;;  %s179_s8 = sadd.s32 1, %s1387_s26 }
   0x5   : > { %s176_s9 = ssub.s32 %s1391_s27, %s1462_s30  ;;  %p189_p0 = scmp.ne.s32.totalorder %s1387_s26, %s1383_s25 }
   0x6   : > { %p177_p1 = scmp.eq.s32.totalorder %s176_s9, 0  ;;  %p190_p2 = scmp.eq.s32.totalorder %s1458_s28, 1 }
   0x7   : > { %p195_p3 = scmp.ne.s32.totalorder %s1383_s25, %s1379_s24  ;;  %p196_p4 = scmp.eq.s32.totalorder %s1084_s29, 1 }
   0x8   : > { %s1473_s10 = scalar_select %p177_p1, %s1387_s26, %s179_s8  }
   0x9   : > { %p1475_p5 = por %p190_p2, %p189_p0  ;;  %p1479_p6 = por %p196_p4, %p195_p3 }
   0xa   : > { %p1087_p7 = scmp.ge.s32.totalorder %s1391_s27, 1  ;;  %p241_p8 = scmp.lt.s32.totalorder %s1391_s27, 3 }
   0xc   : > { %p242_p9 = pnand %p1087_p7, %p241_p8 }
   0xd   : > { %v1265_v0 = vld [vmem:[%s1689_s1 + $0x4] ss:$16 sps:$4 sm:$0xff] (!%p242_p9)   ;;  %s1089_s15 = sshll.u32 (!%p242_p9), %s1458_s28, 2  ;;  %v1267_v1 = vld [vmem:[%s1689_s1 + $0xc] ss:$16 sps:$4 sm:$0xff] (!%p242_p9)   ;;  %v1393_v2 = vmov (!%p242_p9), 0   ;;  %v297_v47 = vlaneseq (!%p242_p9) }
   0xe   : > { %245 = sbr.rel (%p242_p9) target bundleno = 1038 (0x40e), region = 48  ;;  %396 = vmatprep.mubr.bf16.mxu0 (!%p242_p9), %v1393_v2  ;;  %449 = vmatprep.mubr.bf16.mxu1 (!%p242_p9), %v1393_v2  ;;  %p274_p10 = scmp.lt.s32.totalorder (!%p242_p9), %s1089_s15, 7  ;;  %v1269_v3 = vld [vmem:[%s1689_s1] ss:$16 sps:$4 sm:$0xff] (!%p242_p9)   ;;  %v1270_v4 = vld [vmem:[%s1689_s1 + $0x8] ss:$16 sps:$4 sm:$0xff] (!%p242_p9)  }
   0xf   : > { %364 = vmatprep.subr.bf16.mxu0 (!%p242_p9), %v1265_v0  ;;  %417 = vmatprep.subr.bf16.mxu1 (!%p242_p9), %v1267_v1  ;;  %v1271_v5 = vld [vmem:[%s1689_s1 + $0x24] ss:$16 sps:$4 sm:$0xff] (!%p242_p9)   ;;  %v1273_v6 = vld [vmem:[%s1689_s1 + $0x2c] ss:$16 sps:$4 sm:$0xff] (!%p242_p9)   ;;  %v1275_v7 = vld [vmem:[%s1689_s1 + $0x20] ss:$16 sps:$4 sm:$0xff] (!%p242_p9)  }
  0x10   : > { %365 = vmatpush1.bf16.msra.mxu0 (!%p242_p9), %v1269_v3  ;;  %418 = vmatpush1.bf16.msra.mxu1 (!%p242_p9), %v1270_v4  ;;  %v1276_v8 = vld [vmem:[%s1689_s1 + $0x28] ss:$16 sps:$4 sm:$0xff] (!%p242_p9)   ;;  %v1277_v9 = vld [vmem:[%s1691_s3 + $0x40] sm:$0xff] (!%p242_p9)   ;;  %vm357_vm0 = vcmask (!%p242_p9), 261120   ;;  %v1285_v23 = vld [vmem:[%s1691_s3 + $0x50] sm:$0xff] (!%p242_p9)   ;;  %v298_v48 = vshrl.u32 (!%p242_p9), %v297_v47, 7 }
  0x11   : > { %366 = vmatprep.subr.bf16.mxu0 (!%p242_p9), %v1271_v5  ;;  %419 = vmatprep.subr.bf16.mxu1 (!%p242_p9), %v1273_v6  ;;  %v1278_v13 = vld [vmem:[%s1691_s3 + $0xc0] sm:$0xff] (!%p242_p9)   ;;  %v1281_v18 = vld [vmem:[%s1691_s3 + $0x48] sm:$0xff] (!%p242_p9)   ;;  %v1286_v24 = vld [vmem:[%s1691_s3 + $0xd0] sm:$0xff] (!%p242_p9)   ;;  %vm900_vm1 = vcmask (!%p242_p9), 523264   ;;  %s270_s14 = sand.u32 (!%p242_p9), 1, %s1383_s25   ;;  %s1148_s18 = sshll.u32 (!%p242_p9), %s1458_s28, 9 }
  0x12   : > { %v1279_v14 = vld [vmem:[%s1691_s3] sm:$0xff] (!%p242_p9)   ;;  %v1282_v19 = vld [vmem:[%s1691_s3 + $0xc8] sm:$0xff] (!%p242_p9)   ;;  %v1287_v25 = vld [vmem:[%s1691_s3 + $0x10] sm:$0xff] (!%p242_p9)   ;;  %v299_v49 = vsub.s32 (!%p242_p9), 0, %v298_v48  ;;  %v307_v50 = vsub.s32 (!%p242_p9), 2, %v298_v48  ;;  %v303_v52 = vsub.s32 (!%p242_p9), 1, %v298_v48 }
  0x13   : > { %v1280_v17 = vld [vmem:[%s1691_s3 + $0x80] sm:$0xff] (!%p242_p9)   ;;  %v1283_v20 = vld [vmem:[%s1691_s3 + $0x8] sm:$0xff] (!%p242_p9)   ;;  %v1288_v26 = vld [vmem:[%s1691_s3 + $0x90] sm:$0xff] (!%p242_p9)   ;;  %v311_v53 = vsub.s32 (!%p242_p9), 3, %v298_v48  ;;  %s1088_s16 = sshll.u32 (!%p242_p9), %s270_s14, 5  ;;  %s1647_s23 = scalar_lea.sflag (!%p242_p9), [#allocation3], %s270_s14 }
  0x14   : > { %367 = vmatpush1.bf16.msra.mxu0 (!%p242_p9), %v1275_v7  ;;  %420 = vmatpush1.bf16.msra.mxu1 (!%p242_p9), %v1276_v8  ;;  %v1284_v21 = vld [vmem:[%s1691_s3 + $0x88] sm:$0xff] (!%p242_p9)   ;;  %v1289_v27 = vld [vmem:[%s1691_s3 + $0x58] sm:$0xff] (!%p242_p9)   ;;  %v1293_v31 = vld [vmem:[%s1691_s3 + $0x60] sm:$0xff] (!%p242_p9)   ;;  %s1394_s29 = smov (!%p242_p9), [#allocation2]  }
  0x15   : > { %s1703_s15 = smov (!%p274_p10, %s1089_s15), 7  ;;  %1149 = vmatprep.subr.bf16.mxu0 %v1277_v9  ;;  %1177 = vmatprep.subr.bf16.mxu1 %v1278_v13  ;;  %v1290_v28 = vld [vmem:[%s1691_s3 + $0xd8] sm:$0xff]   ;;  %v1294_v32 = vld [vmem:[%s1691_s3 + $0xe0] sm:$0xff]   ;;  %v1297_v35 = vld [vmem:[%s1691_s3 + $0x68] sm:$0xff]  }
  0x16   : > { %s1090_s17 = sshll.u32 %s1703_s15, 3  ;;  %v1291_v29 = vld [vmem:[%s1691_s3 + $0x18] sm:$0xff]   ;;  %v1295_v33 = vld [vmem:[%s1691_s3 + $0x20] sm:$0xff]   ;;  %v1298_v36 = vld [vmem:[%s1691_s3 + $0xe8] sm:$0xff]   ;;  %s1333_s15 = sshll.u32 %s1394_s29, 4  ;;  %s1334_s15 = int_to_ptr.vmem [resolvable:$false] %s1333_s15 }
  0x17   : > { %s277_s22 = scalar_lea.vmem %s1688_s0, %s1090_s17  ;;  %v1292_v30 = vld [vmem:[%s1691_s3 + $0x98] sm:$0xff]   ;;  %v1296_v34 = vld [vmem:[%s1691_s3 + $0xa0] sm:$0xff]   ;;  %v1299_v37 = vld [vmem:[%s1691_s3 + $0x28] sm:$0xff]   ;;  %s272_s17 = scalar_lea.vmem [#allocation2], %s1088_s16 }
  0x18   : > { %v281_v10 = vld [vmem:[%s277_s22] sm:$0xff]  ;;  %v282_v11 = vld [vmem:[%s277_s22 + $0x8] sm:$0xff]  ;;  %v283_v15 = vld [vmem:[%s277_s22 + $0x10] sm:$0xff]  ;;  %s1022_s19 = sshll.u32 %s272_s17, 4  ;;  %s1335_s8 = scalar_lea.vmem %s1334_s15, 1024  ;;  %s1643_s19 = int_to_ptr.vmem [resolvable:$true] %s1022_s19 }
  0x19   : > { %v285_v12 = vpack.c.bf16 %v282_v11, %v281_v10  ;;  %v284_v16 = vld [vmem:[%s277_s22 + $0x18] sm:$0xff]  ;;  %v1300_v38 = vld [vmem:[%s1691_s3 + $0xa8] sm:$0xff]   ;;  %v1301_v39 = vld [vmem:[%s1691_s3 + $0x70] sm:$0xff]   ;;  %s1641_s22 = scalar_lea.hbm %s1695_s7, %s1148_s18  ;;  %s1329_s28 = scalar_lea.vmem %s1643_s19, 512 }
  0x1a   : > { %v286_v22 = vpack.c.bf16 %v284_v16, %v283_v15  ;;  %v1302_v40 = vld [vmem:[%s1691_s3 + $0xf0] sm:$0xff]   ;;  %v1305_v43 = vld [vmem:[%s1691_s3 + $0x78] sm:$0xff]   ;;  %v295_v51 = vld [vmem:[%s1690_s2] sm:$0xf]  ;;  %p1330_p11 = scmp.ne.s32.totalorder %s1643_s19, %s1329_s28  ;;  %p1336_p0 = scmp.lt.s32.totalorder %s1643_s19, %s1334_s15 }
  0x1b   : > { %1099 = vmatmul.mubr.msk.bf16.vlgmr.msra.gmra.mrb[0].mxu0 %vm357_vm0, %v285_v12  ;;  %1101 = vmatmul.mubr.msk.bf16.vlgmr.msra.gmra.mrb[0].mxu1 %vm357_vm0, %v285_v12  ;;  %v1303_v41 = vld [vmem:[%s1691_s3 + $0x30] sm:$0xff]   ;;  %v1306_v44 = vld [vmem:[%s1691_s3 + $0xf8] sm:$0xff]   ;;  %v300_v54 = vrot.slane %v295_v51, %v299_v49  ;;  %v308_v55 = vrot.slane %v295_v51, %v307_v50  ;;  %v304_v56 = vrot.slane %v295_v51, %v303_v52  ;;  %v1309_v50 = vld [vmem:[%s1693_s5] sm:$0xff]   ;;  %p1337_p1 = scmp.lt.s32.totalorder %s1335_s8, %s1329_s28 }
  0x1c   : > { %406 = vmatprep.mubr.bf16.mxu0 %v1393_v2  ;;  %459 = vmatprep.mubr.bf16.mxu1 %v1393_v2  ;;  %v1304_v42 = vld [vmem:[%s1691_s3 + $0xb0] sm:$0xff]   ;;  %v1307_v45 = vld [vmem:[%s1691_s3 + $0x38] sm:$0xff]   ;;  %v312_v57 = vrot.slane %v295_v51, %v311_v53  ;;  %v1310_v51 = vld [vmem:[%s1693_s5 + $0x8] sm:$0xff]   ;;  %p1331_p12 = pnand %p1330_p11, %p1475_p5 }
  0x1d   : > { %1150 = vmatpush3.bf16.msra.mxu0 %v1279_v14  ;;  %1178 = vmatpush3.bf16.msra.mxu1 %v1280_v17  ;;  %v1308_v46 = vld [vmem:[%s1691_s3 + $0xb8] sm:$0xff]   ;;  %v1311_v52 = vld [vmem:[%s1693_s5 + $0x10] sm:$0xff]   ;;  %p1338_p2 = por %p1337_p1, %p1336_p0 }
  0x1e   : > { %1151 = vmatprep.subr.bf16.mxu0 %v1281_v18  ;;  %1179 = vmatprep.subr.bf16.mxu1 %v1282_v19  ;;  %v1312_v53 = vld [vmem:[%s1693_s5 + $0x18] sm:$0xff]   ;;  %p1332_p13 = pneg %p1331_p12 }
  0x20   : > { %p1339_p3 = pnand %p1338_p2, %p1332_p13 }
  0x21   : > { %1152 = vmatpush3.bf16.msra.mxu0 %v1283_v20  ;;  %1180 = vmatpush3.bf16.msra.mxu1 %v1284_v21 }
  0x22   : > { %1153 = vmatprep.subr.bf16.mxu0 %v1285_v23  ;;  %1181 = vmatprep.subr.bf16.mxu1 %v1286_v24 }
  0x23   : > { %1100 = vmatmul.mubr.msk.bf16.gmra.mrb[4].mxu0 %vm357_vm0, %v286_v22  ;;  %1102 = vmatmul.mubr.msk.bf16.gmra.mrb[4].mxu1 %vm357_vm0, %v286_v22 }
  0x25   : > { %1154 = vmatpush3.bf16.msra.mxu0 %v1287_v25  ;;  %1182 = vmatpush3.bf16.msra.mxu1 %v1288_v26 }
  0x26   : > { %1155 = vmatprep.subr.bf16.mxu0 %v1289_v27  ;;  %1183 = vmatprep.subr.bf16.mxu1 %v1290_v28 }
  0x29   : > { %1156 = vmatpush3.bf16.msra.mxu0 %v1291_v29  ;;  %1184 = vmatpush3.bf16.msra.mxu1 %v1292_v30 }
  0x2a   : > { %1157 = vmatprep.subr.bf16.mxu0 %v1293_v31  ;;  %1185 = vmatprep.subr.bf16.mxu1 %v1294_v32 }
  0x2d   : > { %1158 = vmatpush3.bf16.msra.mxu0 %v1295_v33  ;;  %1186 = vmatpush3.bf16.msra.mxu1 %v1296_v34 }
  0x2e   : > { %1159 = vmatprep.subr.bf16.mxu0 %v1297_v35  ;;  %1187 = vmatprep.subr.bf16.mxu1 %v1298_v36 }
  0x31   : > { %1160 = vmatpush3.bf16.msra.mxu0 %v1299_v37  ;;  %1188 = vmatpush3.bf16.msra.mxu1 %v1300_v38 }
  0x32   : > { %1161 = vmatprep.subr.bf16.mxu0 %v1301_v39  ;;  %1189 = vmatprep.subr.bf16.mxu1 %v1302_v40 }
  0x35   : > { %1162 = vmatpush3.bf16.msra.mxu0 %v1303_v41  ;;  %1190 = vmatpush3.bf16.msra.mxu1 %v1304_v42 }
  0x36   : > { %1163 = vmatprep.subr.bf16.mxu0 %v1305_v43  ;;  %1191 = vmatprep.subr.bf16.mxu1 %v1306_v44 }
  0x39   : > { %1164 = vmatpush3.bf16.msra.mxu0 %v1307_v45  ;;  %1192 = vmatpush3.bf16.msra.mxu1 %v1308_v46 }
  0x3a   : > { %1211 = vmatprep.subr.bf16.mxu0 %v1309_v50 }
  0xee   : > { %v398_v58 = vpop.f32.mrb[0].mxu0  ;;  %v451_v59 = vpop.f32.mrb[0].mxu1 }
  0xef   : > { %v399_v60 = vadd.f32 %v398_v58, %v300_v54  ;;  %v452_v61 = vadd.f32 %v451_v59, %v308_v55  ;;  %v400_v62 = vpop.f32.mrb[1].mxu0  ;;  %v453_v63 = vpop.f32.mrb[1].mxu1 }
  0xf0   : > { %v401_v0 = vadd.f32 %v400_v62, %v304_v56  ;;  %v454_v1 = vadd.f32 %v453_v63, %v312_v57  ;;  %v402_v2 = vpop.f32.mrb[2].mxu0  ;;  %v455_v3 = vpop.f32.mrb[2].mxu1 }
  0xf1   : > { %v472_v4 = vmax.f32 %v452_v61, 0.0  ;;  %v403_v5 = vadd.f32 %v402_v2, %v300_v54  ;;  %v456_v6 = vadd.f32 %v455_v3, %v308_v55  ;;  %v404_v7 = vpop.f32.mrb[3].mxu0  ;;  %v457_v8 = vpop.f32.mrb[3].mxu1  ;;  %v470_v12 = vmax.f32 %v399_v60, 0.0 }
  0xf2   : > { %v473_v9 = vmax.f32 %v454_v1, 0.0  ;;  %v405_v10 = vadd.f32 %v404_v7, %v304_v56  ;;  %v458_v11 = vadd.f32 %v457_v8, %v312_v57  ;;  %v471_v15 = vmax.f32 %v401_v0, 0.0 }
  0xf3   : > { %v474_v13 = vmax.f32 %v403_v5, 0.0  ;;  %v476_v14 = vmax.f32 %v456_v6, 0.0 }
  0xf4   : > { %v475_v16 = vmax.f32 %v405_v10, 0.0  ;;  %v477_v17 = vmax.f32 %v458_v11, 0.0 }
  0xf5   : > { %v486_v18 = vpack.c.bf16 %v474_v13, %v470_v12  ;;  %v488_v19 = vpack.c.bf16 %v476_v14, %v472_v4 }
  0xf6   : > { %v487_v20 = vpack.c.bf16 %v475_v16, %v471_v15  ;;  %v489_v21 = vpack.c.bf16 %v477_v17, %v473_v9  ;;  %v408_v22 = vpop.f32.mrb[4].mxu0  ;;  %v461_v23 = vpop.f32.mrb[4].mxu1 }
  0xf7   : > { %v409_v24 = vadd.f32 %v408_v22, %v300_v54  ;;  %v462_v25 = vadd.f32 %v461_v23, %v308_v55  ;;  %v410_v26 = vpop.f32.mrb[5].mxu0  ;;  %v463_v27 = vpop.f32.mrb[5].mxu1 }
  0xf8   : > { %v411_v28 = vadd.f32 %v410_v26, %v304_v56  ;;  %v464_v29 = vadd.f32 %v463_v27, %v312_v57  ;;  %v412_v30 = vpop.f32.mrb[6].mxu0  ;;  %v465_v31 = vpop.f32.mrb[6].mxu1  ;;  %789 = vmatprep.mubr.bf16.mxu0 %v487_v20  ;;  %838 = vmatprep.mubr.bf16.mxu1 %v489_v21 }
  0xf9   : > { %v480_v32 = vmax.f32 %v462_v25, 0.0  ;;  %v413_v33 = vadd.f32 %v412_v30, %v300_v54  ;;  %v466_v34 = vadd.f32 %v465_v31, %v308_v55  ;;  %v414_v35 = vpop.f32.mrb[7].mxu0  ;;  %v467_v36 = vpop.f32.mrb[7].mxu1  ;;  %790 = vmatmul.mubr.bf16.vlgmr.msra.gmra.mrb[8].mxu0 %v486_v18  ;;  %839 = vmatmul.mubr.bf16.vlgmr.msra.gmra.mrb[8].mxu1 %v488_v19  ;;  %v478_v40 = vmax.f32 %v409_v24, 0.0 }
  0xfa   : > { %v481_v37 = vmax.f32 %v464_v29, 0.0  ;;  %v415_v38 = vadd.f32 %v414_v35, %v304_v56  ;;  %v468_v39 = vadd.f32 %v467_v36, %v312_v57  ;;  %v479_v43 = vmax.f32 %v411_v28, 0.0  ;;  %1212 = vmatpush3.bf16.msra.mxu0 %v1309_v50  ;;  %v1103_v56 = vld [vmem:[%s1692_s4] ss:$0 sm:$0xff] }
  0xfb   : > { %v482_v41 = vmax.f32 %v413_v33, 0.0  ;;  %v484_v42 = vmax.f32 %v466_v34, 0.0  ;;  %1213 = vmatprep.subr.bf16.mxu0 %v1310_v51  ;;  %v1136_v29 = vld [vmem:[%s1694_s6] ss:$0 sm:$0xff] }
  0xfc   : > { %v483_v44 = vmax.f32 %v415_v38, 0.0  ;;  %v485_v45 = vmax.f32 %v468_v39, 0.0 }
  0xfd   : > { %v490_v46 = vpack.c.bf16 %v482_v41, %v478_v40  ;;  %v492_v47 = vpack.c.bf16 %v484_v42, %v480_v32 }
  0xfe   : > { %v491_v48 = vpack.c.bf16 %v483_v44, %v479_v43  ;;  %v493_v49 = vpack.c.bf16 %v485_v45, %v481_v37  ;;  %1214 = vmatpush3.bf16.msra.mxu0 %v1310_v51 }
  0xff   : > { %1215 = vmatprep.subr.bf16.mxu0 %v1311_v52 }
 0x100   : > { %797 = vmatprep.mubr.bf16.mxu0 %v491_v48  ;;  %846 = vmatprep.mubr.bf16.mxu1 %v493_v49 }
 0x101   : > { %798 = vmatmul.mubr.bf16.gmra.mrb[12].mxu0 %v490_v46  ;;  %847 = vmatmul.mubr.bf16.gmra.mrb[12].mxu1 %v492_v47 }
 0x102   : > { %1216 = vmatpush3.bf16.msra.mxu0 %v1311_v52 }
 0x103   : > { %1217 = vmatprep.subr.bf16.mxu0 %v1312_v53 }
 0x106   : > { %1218 = vmatpush3.bf16.msra.mxu0 %v1312_v53 }
 0x1cc   : > { %v1165_v54 = vpop.f32.mrb[8].mxu0  ;;  %v1193_v55 = vpop.f32.mrb[8].mxu1 }
 0x1cd   : > { %v1166_v57 = vpop.f32.mrb[9].mxu0  ;;  %v1194_v58 = vpop.f32.mrb[9].mxu1 }
 0x1ce   : > { %v1167_v59 = vadd.f32 %v1166_v57, %v1165_v54  ;;  %v1195_v60 = vadd.f32 %v1194_v58, %v1193_v55  ;;  %v1168_v61 = vpop.f32.mrb[10].mxu0  ;;  %v1196_v62 = vpop.f32.mrb[10].mxu1 }
 0x1cf   : > { %v1169_v63 = vpop.f32.mrb[11].mxu0  ;;  %v1197_v0 = vpop.f32.mrb[11].mxu1 }
 0x1d0   : > { %v792_v1 = vadd.f32 %v1167_v59, %v1103_v56  ;;  %v1170_v2 = vadd.f32 %v1169_v63, %v1168_v61  ;;  %v1198_v3 = vadd.f32 %v1197_v0, %v1196_v62 }
 0x1d2   : > { %v841_v4 = vadd.f32 %v1195_v60, %v792_v1  ;;  %v795_v5 = vadd.f32 %v1170_v2, %v1103_v56 }
 0x1d4   : > { %v844_v6 = vadd.f32 %v1198_v3, %v795_v5  ;;  %v1171_v7 = vpop.f32.mrb[12].mxu0  ;;  %v1199_v8 = vpop.f32.mrb[12].mxu1  ;;  %v855_v11 = vmax.f32 %v841_v4, 0.0 }
 0x1d5   : > { %v1172_v9 = vpop.f32.mrb[13].mxu0  ;;  %v1200_v10 = vpop.f32.mrb[13].mxu1 }
 0x1d6   : > { %v856_v12 = vmax.f32 %v844_v6, 0.0  ;;  %v1173_v13 = vadd.f32 %v1172_v9, %v1171_v7  ;;  %v1201_v14 = vadd.f32 %v1200_v10, %v1199_v8  ;;  %v1174_v15 = vpop.f32.mrb[14].mxu0  ;;  %v1202_v16 = vpop.f32.mrb[14].mxu1 }
 0x1d7   : > { %v1175_v17 = vpop.f32.mrb[15].mxu0  ;;  %v1203_v18 = vpop.f32.mrb[15].mxu1 }
 0x1d8   : > { %v859_v19 = vpack.c.bf16 %v856_v12, %v855_v11  ;;  %v800_v20 = vadd.f32 %v1173_v13, %v1103_v56  ;;  %v1176_v21 = vadd.f32 %v1175_v17, %v1174_v15  ;;  %v1204_v22 = vadd.f32 %v1203_v18, %v1202_v16 }
 0x1da   : > { %v849_v23 = vadd.f32 %v1201_v14, %v800_v20  ;;  %v803_v24 = vadd.f32 %v1176_v21, %v1103_v56  ;;  %1219 = vmatprep.mubr.msk.bf16.mxu0 %vm900_vm1, %v859_v19 }
 0x1dc   : > { %v852_v25 = vadd.f32 %v1204_v22, %v803_v24  ;;  %v857_v26 = vmax.f32 %v849_v23, 0.0 }
 0x1de   : > { %v858_v27 = vmax.f32 %v852_v25, 0.0 }
 0x1e0   : > { %v860_v28 = vpack.c.bf16 %v858_v27, %v857_v26 }
 0x1e2   : > { %1220 = vmatmul.mubr.msk.bf16.vlgmr.msra.gmra.mrb[16].mxu0 %vm900_vm1, %v860_v28 }
 0x2b5   : > { %v1221_v30 = vpop.f32.mrb[16].mxu0 }
 0x2b6   : > { %v950_v31 = vadd.f32 %v1221_v30, %v1136_v29  ;;  %v941_v32 = vpop.f32.mrb[17].mxu0 }
 0x2b7   : > { %v942_v33 = vadd.f32 %v1136_v29, %v941_v32  ;;  %v1222_v34 = vpop.f32.mrb[18].mxu0 }
 0x2b8   : > { %960 = vmax.xlane.f32.xlu1 %v950_v31  ;;  %v944_v35 = vpop.f32.mrb[19].mxu0  ;;  %v953_v36 = vadd.f32 %v1222_v34, %v1136_v29 }
 0x2b9   : > { %956 = vmax.xlane.f32.xlu0 %v942_v33  ;;  %v945_v37 = vadd.f32 %v1136_v29, %v944_v35 }
 0x2bc   : > { %962 = vmax.xlane.f32.xlu1 %v953_v36 }
 0x2bd   : > { %958 = vmax.xlane.f32.xlu0 %v945_v37 }
 0x345   : > { %v961_v38 = vpop.xlane.xlu1 %960 }
 0x346   : > { %v966_v39 = vsub.f32 %v950_v31, %v961_v38  ;;  %v957_v40 = vpop.xlane.xlu0 %956 }
 0x347   : > { %v964_v41 = vsub.f32 %v942_v33, %v957_v40 }
 0x348   : > { %v972_v44 = vmul.f32 1.442695, %v966_v39 }
 0x349   : > { %v968_v42 = vmul.f32 1.442695, %v964_v41  ;;  %v963_v43 = vpop.xlane.xlu1 %962 }
 0x34a   : > { %v959_v45 = vpop.xlane.xlu0 %958  ;;  %v967_v46 = vsub.f32 %v953_v36, %v963_v43 }
 0x34b   : > { %1313 = vpow2.f32 %v968_v42  ;;  %v965_v47 = vsub.f32 %v945_v37, %v959_v45 }
 0x34c   : > { %1315 = vpow2.f32 %v972_v44  ;;  %v974_v49 = vmul.f32 1.442695, %v967_v46 }
 0x34d   : > { %v970_v48 = vmul.f32 1.442695, %v965_v47 }
 0x34f   : > { %1317 = vpow2.f32 %v970_v48 }
 0x350   : > { %1319 = vpow2.f32 %v974_v49 }
 0x355   : > { %v1314_v50 = vpop.eup %1313 }
 0x356   : > { %976 = vadd.xlane.f32.xlu0 %v1314_v50  ;;  %v1316_v51 = vpop.eup %1315 }
 0x359   : > { %v1318_v52 = vpop.eup %1317 }
 0x35a   : > { %980 = vadd.xlane.f32.xlu0 %v1316_v51  ;;  %978 = vadd.xlane.f32.xlu1 %v1318_v52  ;;  %v1320_v53 = vpop.eup %1319 }
 0x35e   : > { %982 = vadd.xlane.f32.xlu1 %v1320_v53 }
 0x3e3   : > { %v977_v54 = vpop.xlane.xlu0 %976 }
 0x3e4   : > { %1321 = vrcp.f32 %v977_v54 }
 0x3e7   : > { %v979_v55 = vpop.xlane.xlu1 %978  ;;  %v981_v56 = vpop.xlane.xlu0 %980 }
 0x3e8   : > { %1323 = vrcp.f32 %v979_v55 }
 0x3e9   : > { %1325 = vrcp.f32 %v981_v56 }
 0x3eb   : > { %v983_v57 = vpop.xlane.xlu1 %982 }
 0x3ec   : > { %1327 = vrcp.f32 %v983_v57 }
 0x3ee   : > { %v1322_v58 = vpop.eup %1321 }
 0x3ef   : > { %v988_v59 = vmul.f32 %v1322_v58, %v977_v54 }
 0x3f1   : > { %v992_v60 = vsub.f32 2.0, %v988_v59 }
 0x3f2   : > { %v1324_v61 = vpop.eup %1323 }
 0x3f3   : > { %v1326_v62 = vpop.eup %1325  ;;  %v996_v63 = vmul.f32 %v1322_v58, %v992_v60  ;;  %v989_v0 = vmul.f32 %v1324_v61, %v979_v55 }
 0x3f4   : > { %v990_v1 = vmul.f32 %v1326_v62, %v981_v56 }
 0x3f5   : > { %v1000_v2 = vmul.f32 %v1314_v50, %v996_v63  ;;  %v993_v3 = vsub.f32 2.0, %v989_v0 }
 0x3f6   : > { %v1328_v4 = vpop.eup %1327  ;;  %v994_v5 = vsub.f32 2.0, %v990_v1 }
 0x3f7   : > { %1004 = vst [vmem:[%s272_s17] sm:$0xff] %v1000_v2  ;;  %v997_v6 = vmul.f32 %v1324_v61, %v993_v3  ;;  %v991_v7 = vmul.f32 %v1328_v4, %v983_v57 }
 0x3f8   : > { %v998_v8 = vmul.f32 %v1326_v62, %v994_v5 }
 0x3f9   : > { %v1001_v9 = vmul.f32 %v1318_v52, %v997_v6  ;;  %v995_v10 = vsub.f32 2.0, %v991_v7 }
 0x3fa   : > { %v1002_v11 = vmul.f32 %v1316_v51, %v998_v8 }
 0x3fb   : > { %1005 = vst [vmem:[%s272_s17 + $0x8] sm:$0xff] %v1001_v9  ;;  %v999_v12 = vmul.f32 %v1328_v4, %v995_v10 }
 0x3fc   : > { %1006 = vst [vmem:[%s272_s17 + $0x10] sm:$0xff] %v1002_v11 }
 0x3fd   : > { %v1003_v13 = vmul.f32 %v1320_v53, %v999_v12 }
 0x3ff   : > { %1007 = vst [vmem:[%s272_s17 + $0x18] sm:$0xff] %v1003_v13 }
 0x400   : > { %1342 = shalt.err (!%p1339_p3)
}
 0x401   : > { %s1343_s9 = scalar_lea.hbm %s1641_s22, 512  ;;  %s1347_s16 = scalar_lea.hbm %s1695_s7, 1024 }
 0x402   : > { %p1344_p4 = scmp.ne.s32.totalorder %s1641_s22, %s1343_s9  ;;  %p1348_p9 = scmp.lt.u32.totalorder %s1641_s22, %s1695_s7 }
 0x403   : > { %p1349_p10 = scmp.lt.u32.totalorder %s1347_s16, %s1343_s9  ;;  %p1351_p12 = scmp.lt.u32.totalorder %s1343_s9, %s1641_s22 }
 0x404   : > { %p1345_p7 = pnand %p1344_p4, %p1475_p5 }
 0x405   : > { %p1350_p11 = por %p1349_p10, %p1348_p9 }
 0x406   : > { %p1346_p8 = pneg %p1345_p7 }
 0x407   : > { %p1352_p13 = por %p1351_p12, %p1350_p11 }
 0x409   : > { %p1353_p0 = pnand %p1352_p13, %p1346_p8 }
 0x40b   : > { %1356 = shalt.err (!%p1353_p0)
}
 0x40c   : > { %s1395_s20 = smov 128   ;;  %s1396_s21 = smov 8  }
 0x40d   : > { %1223 = dma.vmem_to_hbm [thread:$0]  (%p1475_p5), %s1643_s19, 512, %s1641_s22, %s1647_s23, %s1395_s20, %s1395_s20, %s1396_s21  }
 0x40e PF: > { %p1229_p1 = scmp.ge.s32.totalorder %s1391_s27, 2  ;;  %s1037_s28 = sand.u32 1, %s1379_s24  }
 0x40f   : > { %s1038_s29 = scalar_lea.sflag [#allocation3], %s1037_s28 }
 0x410   : > { %p1226_p2 = pnand %p1229_p1, %p1479_p6 }
 0x412   : > { %1374 = dma.done.wait (!%p1226_p2), %s1038_s29, 512  }
 0x413   : > { %1376 = vsyncadd (!%p1226_p2), %s1038_s29, 4294966784  ;;  %p17_p3 = scmp.ge.s32.totalorder %s1462_s30, 4   ;;  %s1698_s24 = smov %s1383_s25 }
 0x414   : > { %s1699_s25 = smov %s1387_s26  ;;  %s1700_s26 = smov %s1473_s10 }
 0x415   : > { %s1701_s27 = smov %s1462_s30  ;;  %19 = sbr.rel (!%p17_p3) target bundleno = 3 (0x3), region = 83 }
 0x41c   :  { %1043 = vsyncpa [#allocation3], 1 }
 0x41d   :  { %1045 = vsyncpa [#allocation3 + $0x1], 1 }

</bundles_post_ra>
